<compile_context>
chip_gen: v5e
topology: v5e:2x2
jax: 0.10.0
libtpu: 0.0.40
codegen_flags: <defaults>
</compile_context>

<pallas_src>
import functools

import jax
import jax.numpy as jnp
import numpy as np
from jax import lax
from jax.experimental import pallas as pl
from jax.experimental.pallas import tpu as pltpu

_EPS = 1e-12  # F.normalize default


def _l2_normalize_rows(x):
    nrm = jnp.sqrt(jnp.sum(x * x, axis=-1, keepdims=True))
    return x / jnp.maximum(nrm, _EPS)


def _round_up(x, m):
    return -(-x // m) * m


def _angle_loss_kernel(ii_ref, jj_ref, ww_ref,        # scalar prefetch (SMEM)
                       row_ref, col_ref,              # fused [s|t] blocks
                       out_ref, acc_ref,
                       *, dp, tiles_per_split):
    del ii_ref, jj_ref                                # only used by index_maps
    c = pl.program_id(0)
    t = pl.program_id(1)

    @pl.when(t == 0)
    def _():
        acc_ref[...] = jnp.zeros_like(acc_ref)

    # Gram tiles on the MXU; contract the feature (lane) axis of both
    # operands.  s/t halves are lane-aligned static slices (dp % 128 == 0).
    dn = (((1,), (1,)), ((), ()))
    s_angle = lax.dot_general(row_ref[:, :dp], col_ref[:, :dp], dn,
                              preferred_element_type=jnp.float32)
    t_angle = lax.dot_general(row_ref[:, dp:], col_ref[:, dp:], dn,
                              preferred_element_type=jnp.float32)

    # Smooth L1 (beta = 1.0, PyTorch default).
    d = s_angle - t_angle
    ad = jnp.abs(d)
    elem = jnp.where(ad < 1.0, 0.5 * d * d, ad - 0.5)

    # Per-tile prefetched weight: 1 diagonal, 2 off-diagonal (stands in for
    # its mirrored twin), 0 for the per-core padding (dummy) tiles.
    w = ww_ref[c * tiles_per_split + t].astype(jnp.float32)
    acc_ref[...] += elem * w                          # pure VPU accumulate

    @pl.when(t == pl.num_programs(1) - 1)
    def _():
        # Single cross-sublane reduction in the epilogue, broadcast to an
        # (8, tn) lane-dense output row for this core (row 0 is used in JAX).
        red = jnp.sum(acc_ref[...], axis=0, keepdims=True)       # (1, tn)
        out_ref[...] = jnp.broadcast_to(red, out_ref.shape)      # (8, tn)


def _vmem_bytes(tm, dp, itemsize, col_bufs):
    inputs = (2 + col_bufs) * tm * (2 * dp) * itemsize   # row dbl-buf + col bufs
    acc_and_temps = 9 * tm * tm * 4                      # acc + matmul/elem temps
    return inputs + acc_and_temps + 8 * tm * 4           # + output block


def distill_angle_old(student, teacher, *, n_anchor, key, tile=512,
                      use_bf16=True, n_splits=2):
    """Pallas implementation of DistillAngleOld.forward (returns scalar loss)."""
    assert student.shape == teacher.shape and student.ndim == 2
    B, D = student.shape
    assert n_anchor <= B

    # torch.multinomial(ones(B), n_anchor, replacement=False) == uniform subset.
    # TODO(synk): not bit-identical to the torch RNG stream, only distributionally.
    anchor_idx = jax.random.permutation(key, B)[:n_anchor]

    # Build the (N, D) difference matrices and L2-normalize rows ONCE in f32
    # (hoisted out of the tile loop; XLA fuses it with the diff construction).
    sd = (student[None, :, :] - student[anchor_idx][:, None, :]).reshape(-1, D)
    td = (teacher[None, :, :] - teacher[anchor_idx][:, None, :]).reshape(-1, D)
    nsd = _l2_normalize_rows(sd.astype(jnp.float32))
    ntd = _l2_normalize_rows(td.astype(jnp.float32))
    N = n_anchor * B

    # bf16 MXU operands by default; f32 accumulation in-kernel.
    in_dtype = jnp.bfloat16 if use_bf16 else jnp.float32
    itemsize = jnp.dtype(in_dtype).itemsize

    # VMEM budget from the actual chip (v7x: 64 MiB/TC -> cap ~48 MiB; v5e/v6e:
    # 128 MiB -> cap ~96 MiB), leaving headroom for compiler-internal scratch.
    try:
        vmem_cap = int(pltpu.get_tpu_info().vmem_capacity_bytes)
    except Exception:  # conservative fallback (assume the smallest, v7x)
        vmem_cap = 64 * 1024 * 1024
    vmem_budget = (vmem_cap * 3) // 4

    # Feature padding to a lane multiple; pick the largest tile that fits the
    # VMEM budget (AI ~ tm flop/byte in bf16) but not (much) larger than N.
    Dp = max(128, _round_up(D, 128))
    tm = min(int(tile), max(128, _round_up(N, 128)))
    tm = max(128, (tm // 128) * 128)
    while tm > 128 and _vmem_bytes(tm, Dp, itemsize, 3) > (7 * vmem_budget) // 10:
        tm -= 128
    tn = tm

    # Pad rows to a tile multiple.  Exact: zero rows/features contribute 0 to
    # the sum; the mean divisor keeps using the unpadded N*N.
    Np = _round_up(N, tm)
    nsd = jnp.pad(nsd, ((0, Np - N), (0, Dp - D)))
    ntd = jnp.pad(ntd, ((0, Np - N), (0, Dp - D)))
    # Fuse student/teacher along the feature axis -> one (Np, 2*Dp) operand:
    # 2 block DMAs per grid step instead of 4.
    fused = jnp.concatenate([nsd, ntd], axis=1).astype(in_dtype)

    # Triangular tile enumeration (j >= i), row-major so the row block is
    # reused across consecutive steps; split contiguously across n_splits
    # cores (v7x has 2 TensorCores; harmless on 1-TC chips), padded with
    # zero-weight dummy tiles that reuse the already-resident blocks.
    grid_m = Np // tm
    pairs = [(i, j) for i in range(grid_m) for j in range(i, grid_m)]
    T = len(pairs)
    n_splits = max(1, min(int(n_splits), T))
    tiles_per_split = -(-T // n_splits)
    ii, jj, ww = [], [], []
    for c in range(n_splits):
        chunk = pairs[c * tiles_per_split:(c + 1) * tiles_per_split]
        pad = tiles_per_split - len(chunk)
        ww += [1 if i == j else 2 for (i, j) in chunk] + [0] * pad
        chunk = chunk + [chunk[-1]] * pad
        ii += [p[0] for p in chunk]
        jj += [p[1] for p in chunk]
    ii = jnp.asarray(ii, dtype=jnp.int32)
    jj = jnp.asarray(jj, dtype=jnp.int32)
    ww = jnp.asarray(ww, dtype=jnp.int32)

    def row_map(c, t, ii_ref, jj_ref, ww_ref):
        return (ii_ref[c * tiles_per_split + t], 0)

    def col_map(c, t, ii_ref, jj_ref, ww_ref):
        return (jj_ref[c * tiles_per_split + t], 0)

    row_spec = pl.BlockSpec((tm, 2 * Dp), row_map)
    # The col block index changes every step; when Dp is small the per-step
    # MXU work is short, so use a 3-deep pipeline to hide the col DMA.
    if Dp <= 256 and tiles_per_split > 2:
        col_spec = pl.BlockSpec((tn, 2 * Dp), col_map,
                                pipeline_mode=pl.Buffered(3))
        col_bufs = 3
    else:
        col_spec = pl.BlockSpec((tn, 2 * Dp), col_map)
        col_bufs = 2

    est = _vmem_bytes(tm, Dp, itemsize, col_bufs)
    vmem_limit = int(min(vmem_budget, max(32 * 1024 * 1024, 2 * est)))

    kernel = functools.partial(_angle_loss_kernel, dp=Dp,
                               tiles_per_split=tiles_per_split)

    partial = pl.pallas_call(
        kernel,
        out_shape=jax.ShapeDtypeStruct((n_splits * 8, tn), jnp.float32),
        grid_spec=pltpu.PrefetchScalarGridSpec(
            num_scalar_prefetch=3,
            grid=(n_splits, tiles_per_split),
            in_specs=[row_spec, col_spec],
            out_specs=pl.BlockSpec((8, tn), lambda c, t, ii, jj, ww: (c, 0)),
            scratch_shapes=[pltpu.VMEM((tm, tn), jnp.float32)],
        ),
        compiler_params=pltpu.CompilerParams(
            dimension_semantics=("parallel", "arbitrary"),
            vmem_limit_bytes=vmem_limit),
    )(ii, jj, ww, fused, fused)

    # Row 0 of each core's 8-row block carries its partial sum; final lane
    # reduction + 'elementwise_mean' in plain JAX.
    return jnp.sum(partial[::8, :]) / jnp.float32(N * N)


def _reference(student, teacher, *, n_anchor, key):
    """Pure-JAX reference matching the PyTorch forward (f32, exact matmuls)."""
    B, D = student.shape
    anchor_idx = jax.random.permutation(key, B)[:n_anchor]
    sd = (student[None, :, :] - student[anchor_idx][:, None, :]).reshape(-1, D)
    td = (teacher[None, :, :] - teacher[anchor_idx][:, None, :]).reshape(-1, D)
    nsd = _l2_normalize_rows(sd.astype(jnp.float32))
    ntd = _l2_normalize_rows(td.astype(jnp.float32))
    s_angle = jnp.matmul(nsd, nsd.T, precision=lax.Precision.HIGHEST)
    t_angle = jnp.matmul(ntd, ntd.T, precision=lax.Precision.HIGHEST)
    d = s_angle - t_angle
    ad = jnp.abs(d)
    return jnp.mean(jnp.where(ad < 1.0, 0.5 * d * d, ad - 0.5))


if __name__ == "__main__":
    B, D = 16, 96
    n_anchor = 16          # module default is 30; must be <= B for the test

    key = jax.random.PRNGKey(0)
    k_s, k_t, k_anchor = jax.random.split(key, 3)
    student = jax.random.normal(k_s, (B, D), dtype=jnp.float32)
    teacher = jax.random.normal(k_t, (B, D), dtype=jnp.float32)

    ref = jax.block_until_ready(
        _reference(student, teacher, n_anchor=n_anchor, key=k_anchor))

    # 1) Exact f32-operand path with a small tile: exercises the triangular
    #    multi-tile grid, the 2-way core split and the zero-weight dummy tile.
    loss_f32 = jax.block_until_ready(
        distill_angle_old(student, teacher, n_anchor=n_anchor, key=k_anchor,
                          tile=128, use_bf16=False))
    np.testing.assert_allclose(np.asarray(loss_f32), np.asarray(ref),
                               rtol=2e-4, atol=1e-5)

    # 2) Default fast path: bf16 MXU operands (f32 accumulation), auto tile.
    loss_bf16 = jax.block_until_ready(
        distill_angle_old(student, teacher, n_anchor=n_anchor, key=k_anchor))
    np.testing.assert_allclose(np.asarray(loss_bf16), np.asarray(ref),
                               rtol=5e-2, atol=5e-3)

    print("KERNEL_OK")
</pallas_src>

<mosaic_0001>
module attributes {stable_mosaic.version = 11 : i64} {
  func.func @_angle_loss_kernel(%arg0: i32, %arg1: i32, %arg2: memref<4xi32, #tpu.memory_space<smem>>, %arg3: memref<4xi32, #tpu.memory_space<smem>>, %arg4: memref<4xi32, #tpu.memory_space<smem>>, %arg5: memref<128x256xf32, #tpu.memory_space<vmem>>, %arg6: memref<128x256xf32, #tpu.memory_space<vmem>>, %arg7: memref<8x128xf32, #tpu.memory_space<vmem>>, %arg8: memref<128x128xf32, #tpu.memory_space<vmem>>) attributes {dimension_semantics = [#tpu.dimension_semantics<parallel>, #tpu.dimension_semantics<arbitrary>], iteration_bounds = array<i64: 2, 2>, scalar_prefetch = 3 : i64, scratch_operands = 1 : i64, tpu.core_type = #tpu.core_type<tc>, window_params = [{transform_indices = @transform_0, window_bounds = array<i64: 128, 256>}, {transform_indices = @transform_1, window_bounds = array<i64: 128, 256>}, {transform_indices = @transform_2, window_bounds = array<i64: 8, 128>}]} {
    %c0_i32 = arith.constant 0 : i32
    %0 = arith.cmpi eq, %arg1, %c0_i32 : i32
    %1 = arith.extui %0 : i1 to i32
    %c0_i32_0 = arith.constant 0 : i32
    %2 = arith.cmpi ne, %1, %c0_i32_0 : i32
    scf.if %2 {
      %cst_16 = arith.constant 0.000000e+00 : f32
      %32 = vector.broadcast %cst_16 : f32 to vector<128x128xf32>
      %c0_17 = arith.constant 0 : index
      %c0_18 = arith.constant 0 : index
      %33 = vector.load %arg8[%c0_17, %c0_18] : memref<128x128xf32, #tpu.memory_space<vmem>>, vector<128x128xf32>
      tpu.vector_store %arg8[%c0_17, %c0_18], %32 {strides = array<i32>} : memref<128x128xf32, #tpu.memory_space<vmem>>, vector<128x128xf32>,
    } else {
    }
    %c0 = arith.constant 0 : index
    %c0_1 = arith.constant 0 : index
    %3 = vector.load %arg5[%c0, %c0_1] : memref<128x256xf32, #tpu.memory_space<vmem>>, vector<128x128xf32>
    %c0_2 = arith.constant 0 : index
    %c0_3 = arith.constant 0 : index
    %4 = vector.load %arg6[%c0_2, %c0_3] : memref<128x256xf32, #tpu.memory_space<vmem>>, vector<128x128xf32>
    %cst = arith.constant dense<0.000000e+00> : vector<128x128xf32>
    %5 = tpu.matmul %3, %4, %cst {dimension_numbers = #tpu.dot_dimension_numbers<[1], [1], [0], [0], [0, 0, 1, 0], [], []>} : vector<128x128xf32>, vector<128x128xf32>, vector<128x128xf32> -> vector<128x128xf32>
    %c0_4 = arith.constant 0 : index
    %c128 = arith.constant 128 : index
    %6 = vector.load %arg5[%c0_4, %c128] : memref<128x256xf32, #tpu.memory_space<vmem>>, vector<128x128xf32>
    %c0_5 = arith.constant 0 : index
    %c128_6 = arith.constant 128 : index
    %7 = vector.load %arg6[%c0_5, %c128_6] : memref<128x256xf32, #tpu.memory_space<vmem>>, vector<128x128xf32>
    %cst_7 = arith.constant dense<0.000000e+00> : vector<128x128xf32>
    %8 = tpu.matmul %6, %7, %cst_7 {dimension_numbers = #tpu.dot_dimension_numbers<[1], [1], [0], [0], [0, 0, 1, 0], [], []>} : vector<128x128xf32>, vector<128x128xf32>, vector<128x128xf32> -> vector<128x128xf32>
    %9 = arith.subf %5, %8 : vector<128x128xf32>
    %10 = math.absf %9 : vector<128x128xf32>
    %cst_8 = arith.constant 1.000000e+00 : f32
    %11 = vector.broadcast %cst_8 : f32 to vector<128x128xf32>
    %12 = arith.cmpf olt, %10, %11 : vector<128x128xf32>
    %cst_9 = arith.constant 5.000000e-01 : f32
    %13 = vector.broadcast %cst_9 : f32 to vector<128x128xf32>
    %14 = arith.mulf %13, %9 : vector<128x128xf32>
    %15 = arith.mulf %14, %9 : vector<128x128xf32>
    %cst_10 = arith.constant 5.000000e-01 : f32
    %16 = vector.broadcast %cst_10 : f32 to vector<128x128xf32>
    %17 = arith.subf %10, %16 : vector<128x128xf32>
    %18 = arith.select %12, %15, %17 : vector<128x128xi1>, vector<128x128xf32>
    %c2_i32 = arith.constant 2 : i32
    %19 = arith.muli %arg0, %c2_i32 : i32
    %20 = arith.addi %19, %arg1 : i32
    %21 = arith.index_cast %20 : i32 to index
    %22 = memref.load %arg4[%21] : memref<4xi32, #tpu.memory_space<smem>>
    %23 = arith.sitofp %22 : i32 to f32
    %c0_11 = arith.constant 0 : index
    %c0_12 = arith.constant 0 : index
    %24 = vector.load %arg8[%c0_11, %c0_12] : memref<128x128xf32, #tpu.memory_space<vmem>>, vector<128x128xf32>
    %25 = vector.broadcast %23 : f32 to vector<128x128xf32>
    %26 = arith.mulf %18, %25 : vector<128x128xf32>
    %27 = arith.addf %24, %26 : vector<128x128xf32>
    %c0_13 = arith.constant 0 : index
    %c0_14 = arith.constant 0 : index
    %28 = vector.load %arg8[%c0_13, %c0_14] : memref<128x128xf32, #tpu.memory_space<vmem>>, vector<128x128xf32>
    tpu.vector_store %arg8[%c0_13, %c0_14], %27 {strides = array<i32>} : memref<128x128xf32, #tpu.memory_space<vmem>>, vector<128x128xf32>,
    %c1_i32 = arith.constant 1 : i32
    %29 = arith.cmpi eq, %arg1, %c1_i32 : i32
    %30 = arith.extui %29 : i1 to i32
    %c0_i32_15 = arith.constant 0 : i32
    %31 = arith.cmpi ne, %30, %c0_i32_15 : i32
    scf.if %31 {
      %c0_16 = arith.constant 0 : index
      %c0_17 = arith.constant 0 : index
      %32 = vector.load %arg8[%c0_16, %c0_17] : memref<128x128xf32, #tpu.memory_space<vmem>>, vector<128x128xf32>
      %cst_18 = arith.constant dense<0.000000e+00> : vector<128xf32>
      %33 = vector.multi_reduction <add>, %32, %cst_18 [0] : vector<128x128xf32> to vector<128xf32>
      %34 = vector.shape_cast %33 : vector<128xf32> to vector<1x128xf32>
      %35 = vector.shape_cast %34 : vector<1x128xf32> to vector<1x128xf32>
      %36 = vector.broadcast %35 : vector<1x128xf32> to vector<8x128xf32>
      %c0_19 = arith.constant 0 : index
      %c0_20 = arith.constant 0 : index
      %37 = vector.load %arg7[%c0_19, %c0_20] : memref<8x128xf32, #tpu.memory_space<vmem>>, vector<8x128xf32>
      tpu.vector_store %arg7[%c0_19, %c0_20], %36 {strides = array<i32>} : memref<8x128xf32, #tpu.memory_space<vmem>>, vector<8x128xf32>,
    } else {
    }
    return
  }
  func.func @transform_0(%arg0: i32, %arg1: i32, %arg2: memref<4xi32, #tpu.memory_space<smem>>, %arg3: memref<4xi32, #tpu.memory_space<smem>>, %arg4: memref<4xi32, #tpu.memory_space<smem>>) -> (i32, i32) {
    %c2_i32 = arith.constant 2 : i32
    %0 = arith.muli %arg0, %c2_i32 : i32
    %1 = arith.addi %0, %arg1 : i32
    %2 = arith.index_cast %1 : i32 to index
    %3 = memref.load %arg2[%2] : memref<4xi32, #tpu.memory_space<smem>>
    %c0_i32 = arith.constant 0 : i32
    %c0_i32_0 = arith.constant 0 : i32
    return %3, %c0_i32 : i32, i32
  }
  func.func @transform_1(%arg0: i32, %arg1: i32, %arg2: memref<4xi32, #tpu.memory_space<smem>>, %arg3: memref<4xi32, #tpu.memory_space<smem>>, %arg4: memref<4xi32, #tpu.memory_space<smem>>) -> (i32, i32) {
    %c2_i32 = arith.constant 2 : i32
    %0 = arith.muli %arg0, %c2_i32 : i32
    %1 = arith.addi %0, %arg1 : i32
    %2 = arith.index_cast %1 : i32 to index
    %3 = memref.load %arg3[%2] : memref<4xi32, #tpu.memory_space<smem>>
    %c0_i32 = arith.constant 0 : i32
    %c0_i32_0 = arith.constant 0 : i32
    return %3, %c0_i32 : i32, i32
  }
  func.func @transform_2(%arg0: i32, %arg1: i32, %arg2: memref<4xi32, #tpu.memory_space<smem>>, %arg3: memref<4xi32, #tpu.memory_space<smem>>, %arg4: memref<4xi32, #tpu.memory_space<smem>>) -> (i32, i32) {
    %c0_i32 = arith.constant 0 : i32
    %c0_i32_0 = arith.constant 0 : i32
    return %arg0, %c0_i32 : i32, i32
  }
}

</mosaic_0001>

<bundles_post_ra>
// kernel: tpu_custom_call.1
= control target key start
LH: loop header
LB: loop body
LE: loop exit
PB: predicated region body
PF: predicated region fallthrough
CT: control target
= control target key end

     0   :  { %s1300_s24 = smov [#allocation4]   ;;  %s1301_s25 = smov [#allocation5]   ;;  %s1765_s0 = inlined_call_operand.hbm [shape: s32[4], index: 0, kind: input, shape index: {}]   ;;  %s1766_s3 = inlined_call_operand.hbm [shape: f32[256,256], index: 3, kind: input, shape index: {}]   ;;  %s1767_s4 = inlined_call_operand.hbm [shape: f32[256,256], index: 4, kind: input, shape index: {}]   ;;  %s1768_s5 = inlined_call_operand.hbm [shape: f32[16,128], index: 5, kind: output, shape index: {}]   ;;  %s1769_s1 = inlined_call_operand.hbm [shape: s32[4], index: 1, kind: input, shape index: {}]   ;;  %s1770_s2 = inlined_call_operand.vmem [shape: s32[4], index: 2, kind: input, shape index: {}]  }
   0x1   :  { %1785 = sst [smem:[#allocation32_spill]] %s1768_s5  ;;  %s11_s20 = sshll.u32 %s1765_s0, 4  ;;  %s12_s20 = int_to_ptr.hbm [resolvable:$true] %s11_s20 }
   0x2   :  { %s16_s23 = sshll.u32 %s1769_s1, 4  ;;  %s21_s28 = sshll.u32 %s1770_s2, 4  ;;  %s17_s23 = int_to_ptr.hbm [resolvable:$true] %s16_s23  ;;  %s22_s28 = int_to_ptr.vmem [resolvable:$true] %s21_s28 }
   0x3   :  { %14 = dma.hbm_to_smem %s12_s20, 16, %s1300_s24, [#allocation3] }
   0x4   :  { %19 = dma.hbm_to_smem %s17_s23, 16, %s1301_s25, [#allocation3] }
   0x5   :  { %s1302_s29 = smov [#allocation6]  }
   0x6   :  { %24 = dma.vmem_to_smem %s22_s28, 16, %s1302_s29, [#allocation3] }
   0x7   :  { %1230 = dma.done.wait [#allocation3], 48 }
   0x8   :  { %1231 = vsyncadd [#allocation3], 4294967248 }
   0x9   :  { %27 = sfence }
   0xa   :  { %28 = vsyncpa [#allocation8], 0 }
   0xb   :  { %30 = vsyncpa [#allocation8 + $0x1], 0 }
   0xc   :  { %31 = vsyncpa [#allocation11], 0 }
   0xd   :  { %33 = vsyncpa [#allocation11 + $0x1], 0 }
   0xe   :  { %34 = vsyncpa [#allocation9], 0 }
   0xf   :  { %36 = vsyncpa [#allocation9 + $0x1], 0  ;;  %s1345_s0 = smov 0   ;;  %s1347_s1 = smov 0  }
  0x10   :  { %s1349_s30 = smov 0   ;;  %s1351_s6 = smov 0  }
  0x11   :  { %s1353_s2 = smov 0   ;;  %s1355_s7 = smov 0  }
  0x12   :  { %s1357_s8 = smov 0   ;;  %s1359_s9 = smov 0  }
  0x13   :  { %s1361_s10 = smov 0   ;;  %s1363_s11 = smov 0  }
  0x14   :  { %s1365_s12 = smov 0   ;;  %s1367_s13 = smov 0  }
  0x15   :  { %s1369_s14 = smov 0   ;;  %s1371_s15 = smov 0  }
  0x16 LB: > { %1786 = sst [smem:[#allocation21_spill]] %s1246_s0  ;;  %s1771_s16 = sadd.s32 4294967295, %s1298_s15   ;;  %s1298_s15 = sphi %s1371_s15, %s42_s15   ;;  %s1294_s14 = sphi %s1369_s14, %s1831_s14   ;;  %s1290_s13 = sphi %s1367_s13, %s1840_s13   ;;  %s1286_s12 = sphi %s1365_s12, %s1829_s12   ;;  %s1282_s11 = sphi %s1363_s11, %s1828_s11   ;;  %s1278_s10 = sphi %s1361_s10, %s1827_s10   ;;  %s1274_s9 = sphi %s1359_s9, %s1839_s9   ;;  %s1270_s8 = sphi %s1357_s8, %s1838_s8   ;;  %s1266_s7 = sphi %s1355_s7, %s1837_s7   ;;  %s1262_s2 = sphi %s1353_s2, %s1836_s2   ;;  %s1258_s6 = sphi %s1351_s6, %s1835_s6   ;;  %s1254_s30 = sphi %s1349_s30, %s1825_s30   ;;  %s1250_s1 = sphi %s1347_s1, %s1834_s1   ;;  %s1246_s0 = sphi %s1345_s0, %s1833_s0  }
  0x17   : > { %1787 = sst [smem:[#allocation22_spill]] %s1254_s30  ;;  %s51_s18 = sadd.s32 1, %s1290_s13 }
  0x18   : > { %1788 = sst [smem:[#allocation23_spill]] %s1278_s10  ;;  %s54_s19 = sadd.s32 1, %s1294_s14 }
  0x19   : > { %1789 = sst [smem:[#allocation24_spill]] %s1290_s13  ;;  %p52_p0 = scmp.ge.s32.totalorder %s51_s18, 2 }
  0x1a   : > { %1790 = sst [smem:[#allocation25_spill]] %s1294_s14  ;;  %s826_s20 = sshll.u32 %s1294_s14, 1 }
  0x1b   : > { %s1419_s21 = sadd.s32 %s1290_s13, %s826_s20  ;;  %s1842_s18 = smov (%p52_p0, %s51_s18), 0 }
  0x1c   : > { %1791 = sst [smem:[#allocation26_spill]] %s1842_s18  ;;  %s1844_s19 = smov (!%p52_p0, %s54_s19), %s1294_s14 }
  0x1d   : > { %s60_s23 = sld [smem:[#allocation4 + %s1419_s21]]  ;;  %p74_p1 = scmp.ne.s32.totalorder %s1278_s10, %s1274_s9 }
  0x1e   : > { %p56_p2 = scmp.ge.s32.totalorder %s1844_s19, 2  ;;  %p1783_p3 = scmp.eq.s32.totalorder %s1298_s15, 0 }
  0x1f   : > { %p80_p4 = scmp.ne.s32.totalorder %s1274_s9, %s1270_s8  ;;  %p1432_p5 = scmp.eq.s32.totalorder %s1771_s16, 0 }
  0x20   : > { %s1846_s19 = smov (%p56_p2, %s1844_s19), 0  ;;  %p1440_p6 = por %p1783_p3, %p74_p1 }
  0x21   : > { %1793 = sst [smem:[#allocation27_spill]] %s1846_s19  ;;  %p1446_p7 = por %p1432_p5, %p80_p4 }
  0x22   : > { %s827_s27 = sshll.u32 %s1846_s19, 1  ;;  %s1452_s28 = sld [smem:[#allocation5 + %s1419_s21]] }
  0x23   : > { %s62_s29 = sadd.s32 %s827_s27, %s1842_s18  ;;  %s122_s8 = ssub.s32 %s1294_s14, %s1846_s19 }
  0x24   : > { %s63_s20 = sld [smem:[#allocation4 + %s62_s29]]  ;;  %p123_p8 = scmp.eq.s32.totalorder %s122_s8, 0 }
  0x25   : > { %s1457_s22 = sld [smem:[#allocation5 + %s62_s29]]  ;;  %s125_s17 = sadd.s32 1, %s1254_s30 }
  0x26   : > { %s1461_s16 = scalar_select %p123_p8, %s1254_s30, %s125_s17  }
  0x27   : > { %p135_p9 = scmp.ne.s32.totalorder %s1254_s30, %s1250_s1  ;;  %s1797_s13 = sadd.s32 4294967295, %s1298_s15  }
  0x28   : > { %1796 = sst [smem:[#allocation28_spill]] %s1461_s16  ;;  %p136_p10 = scmp.eq.s32.totalorder %s1797_s13, 3 }
  0x29   : > { %p141_p11 = scmp.ne.s32.totalorder %s1250_s1, %s1246_s0  ;;  %s1798_s27 = sadd.s32 4294967294, %s1298_s15  }
  0x2a   : > { %p142_p12 = scmp.eq.s32.totalorder %s1798_s27, 3  ;;  %p1471_p13 = por %p136_p10, %p135_p9 }
  0x2b   : > { %s64_s29 = ssub.s32 %s60_s23, %s63_s20  ;;  %p1782_p2 = scmp.lt.s32.totalorder %s1298_s15, 4 }
  0x2c   : > { %p1475_p0 = por %p142_p12, %p141_p11  ;;  %p65_p1 = scmp.eq.s32.totalorder %s64_s29, 0 }
  0x2d   : > { %s162_s17 = sand.u32 1, %s1278_s10   ;;  %s1802_s18 = sadd.s32 1, %s1278_s10 }
  0x2e   : > { %s1800_s19 = scalar_select %p1475_p0, 1, 0 }
  0x2f   : > { %s1484_s13 = scalar_select %p65_p1, %s1278_s10, %s1802_s18  }
  0x30   : > { %1801 = sst [smem:[#allocation29_spill]] %s1800_s19  ;;  %s832_s27 = sshll.u32 %s162_s17, 8 }
  0x31   : > { %1803 = sst [smem:[#allocation30_spill]] %s1484_s13  ;;  %p1490_p4 = pnand %p1782_p2, %p1440_p6 }
  0x32   : > { %s905_s23 = scalar_select %p1440_p6, [#allocation4], [#allocation13] }
  0x33   : > { %s906_s20 = scalar_select %p1440_p6, %s1419_s21, 0 }
  0x34   : > { %s1848_s23 = smov (!%p1782_p2, %s905_s23), [#allocation15]  ;;  %s166_s18 = scalar_lea.vmem [#allocation7], %s832_s27 }
  0x35   : > { %s1850_s20 = smov (!%p1782_p2, %s906_s20), 0  ;;  %s1503_s29 = sshll.u32 %s166_s18, 4 }
  0x36   : > { %1805 = sst [smem:[#allocation31_spill]] %s1503_s29  ;;  %p842_p8 = scmp.ge.s32.totalorder %s1298_s15, 1 }
  0x37   : > { %s169_s13 = sld [smem:[%s1848_s23 + %s1850_s20]]  ;;  %p212_p9 = scmp.lt.s32.totalorder %s1298_s15, 5 }
  0x38   : > { %s96_s16 = ssub.s32 %s1452_s28, %s1457_s22  ;;  %s99_s23 = sadd.s32 1, %s1266_s7 }
  0x39   : > { %p1508_p10 = pnand %p842_p8, %p212_p9  ;;  %p1517_p6 = scmp.eq.s32.totalorder %s96_s16, 0 }
  0x3a   : > { %s163_s20 = scalar_lea.sflag [#allocation8], %s162_s17  ;;  %p1090_p1 = pneg %p1490_p4 }
  0x3b   : > { %s1093_s16 = scalar_lea.hbm %s1766_s3, 512 }
  0x3d   : > { %s870_s25 = sshll.u32 %s169_s13, 8 }
  0x3e   : > { %s175_s0 = scalar_lea.hbm %s1766_s3, %s870_s25 }
  0x3f   : > { %s176_s18 = sshll.u32 %s175_s0, 4  ;;  %s177_s18 = int_to_ptr.hbm [resolvable:$true] %s176_s18 }
  0x40   : > { %s1086_s29 = sshra.s32 %s177_s18, 4  ;;  %s1087_s29 = int_to_ptr.hbm [resolvable:$true] %s1086_s29 }
  0x41   : > { %s1088_s5 = scalar_lea.hbm %s1087_s29, 256  ;;  %p1094_p2 = scmp.lt.s32.totalorder %s1087_s29, %s1766_s3 }
  0x42   : > { %p1089_p12 = scmp.ne.s32.totalorder %s1087_s29, %s1088_s5  ;;  %p1095_p3 = scmp.lt.s32.totalorder %s1093_s16, %s1088_s5 }
  0x44   : > { %p1091_p8 = pnand %p1090_p1, %p1089_p12  ;;  %p1096_p0 = por %p1095_p3, %p1094_p2 }
  0x46   : > { %p1092_p9 = pneg %p1091_p8 }
  0x48   : > { %p1097_p11 = pnand %p1096_p0, %p1092_p9 }
  0x4a   : > { %1100 = shalt.err (!%p1097_p11)
}
  0x4b   : > { %s1784_s0 = smov 256   ;;  %s1808_s17 = sld [smem:[#allocation31_spill]] }
  0x4c   : > { %s1304_s5 = smov 16   ;;  %p112_p3 = scmp.ne.s32.totalorder %s1262_s2, %s1258_s6 }
  0x4d   : > { %s1542_s29 = scalar_select %p1517_p6, %s1266_s7, %s99_s23  }
  0x4e   : > { %p1810_p0 = scmp.eq.s32.totalorder %s1298_s15, 0  ;;  %p1811_p2 = scmp.ne.s32.totalorder %s1266_s7, %s1262_s2 }
  0x4f   : > { %s188_s25 = sand.u32 1, %s1266_s7   ;;  %p1554_p12 = por %p112_p3, %p1432_p5 }
  0x50   : > { %p108_p11 = por %p1811_p2, %p1810_p0  ;;  %s837_s30 = sshll.u32 %s188_s25, 8 }
  0x51   : > { %s1809_s13 = int_to_ptr.vmem [resolvable:$true] %s1808_s17  ;;  %p1813_p1 = scmp.lt.s32.totalorder %s1298_s15, 4 }
  0x52   : > { %920 = dma.hbm_to_vmem [thread:$0]  (!%p1490_p4), %s177_s18, 4096, %s1809_s13, %s163_s20, %s1784_s0, %s1784_s0, %s1304_s5  }
  0x53   : > { %p1560_p8 = pnand %p1813_p1, %p108_p11  ;;  %s1852_s21 = smov (!%p108_p11, %s1419_s21), 0 }
  0x54   : > { %s908_s18 = scalar_select %p108_p11, [#allocation5], [#allocation14] }
  0x55   : > { %p1815_p4 = pmov %p1813_p1  ;;  %p1816_p6 = pmov %p1813_p1 }
  0x56   : > { %s192_s27 = scalar_lea.vmem [#allocation10], %s837_s30  ;;  %s189_s17 = scalar_lea.sflag [#allocation11], %s188_s25 }
  0x57   : > { %s1854_s18 = smov (!%p1815_p4, %s908_s18), [#allocation16]  ;;  %s1856_s21 = smov (!%p1816_p6, %s1852_s21), 0 }
  0x58   : > { %s195_s6 = sld [smem:[%s1854_s18 + %s1856_s21]]  ;;  %s204_s24 = sshll.u32 %s192_s27, 4  ;;  %s205_s24 = int_to_ptr.vmem [resolvable:$true] %s204_s24 }
  0x59   : > { %p1120_p9 = pneg %p1560_p8  ;;  %s1123_s18 = scalar_lea.hbm %s1767_s4, 512 }
  0x5e   : > { %s872_s23 = sshll.u32 %s195_s6, 8 }
  0x5f   : > { %s201_s19 = scalar_lea.hbm %s1767_s4, %s872_s23 }
  0x60   : > { %s202_s28 = sshll.u32 %s201_s19, 4  ;;  %s203_s28 = int_to_ptr.hbm [resolvable:$true] %s202_s28 }
  0x61   : > { %s1116_s13 = sshra.s32 %s203_s28, 4  ;;  %s1117_s13 = int_to_ptr.hbm [resolvable:$true] %s1116_s13 }
  0x62   : > { %s1118_s0 = scalar_lea.hbm %s1117_s13, 256  ;;  %p1124_p2 = scmp.lt.s32.totalorder %s1117_s13, %s1767_s4 }
  0x63   : > { %p1119_p5 = scmp.ne.s32.totalorder %s1117_s13, %s1118_s0  ;;  %p1125_p11 = scmp.lt.s32.totalorder %s1123_s18, %s1118_s0 }
  0x65   : > { %p1121_p3 = pnand %p1120_p9, %p1119_p5  ;;  %p1126_p1 = por %p1125_p11, %p1124_p2 }
  0x67   : > { %p1122_p0 = pneg %p1121_p3 }
  0x69   : > { %p1127_p4 = pnand %p1126_p1, %p1122_p0 }
  0x6b   : > { %1130 = shalt.err (!%p1127_p4)
}
  0x6c   : > { %s1817_s25 = smov 256   ;;  %216 = sbr.rel (%p1508_p10) target bundleno = 470 (0x1d6), region = 28 }
  0x6d   : > { %925 = dma.hbm_to_vmem [thread:$0]  (!%p1560_p8), %s203_s28, 4096, %s205_s24, %s189_s17, %s1817_s25, %s1817_s25, %s1304_s5  }
  0x6e   : > { %s218_s23 = sand.u32 (!%p1508_p10), 1, %s1274_s9  }
  0x6f   : > { %s843_s20 = sshll.u32 (!%p1508_p10), %s218_s23, 8  ;;  %s219_s16 = scalar_lea.sflag (!%p1508_p10), [#allocation8], %s218_s23 }
  0x70   : > { %s1588_s19 = scalar_lea.vmem (!%p1508_p10), [#allocation7], %s843_s20 }
  0x71   : > { %1233 = dma.done.wait (%p1446_p7), %s219_s16, 4096  }
  0x72   : > { %1235 = vsyncadd (%p1446_p7), %s219_s16, 4294963200  ;;  %s228_s0 = sand.u32 1, %s1262_s2  }
  0x73   : > { %s844_s14 = sshll.u32 %s228_s0, 8  ;;  %s229_s5 = scalar_lea.sflag [#allocation11], %s228_s0 }
  0x74   : > { %s1595_s24 = scalar_lea.vmem [#allocation10], %s844_s14 }
  0x75   : > { %1237 = dma.done.wait (%p1554_p12), %s229_s5, 4096  }
  0x76   : > { %1239 = vsyncadd (%p1554_p12), %s229_s5, 4294963200  ;;  %s256_s10 = sand.u32 1, %s1250_s1   ;;  %p846_p7 = scmp.ne.s32.totalorder %s1282_s11, 0 }
  0x77   : > { %s1604_s28 = sshll.u32 %s256_s10, 3 }
  0x78   : > { %s258_s26 = scalar_lea.vmem [#allocation12], %s1604_s28  ;;  %270 = sbr.rel (%p846_p7) target bundleno = 142 (0x8e), region = 40 }
  0x7d   : > { %v1305_v0 = vmov 0.0  }
  0x7e   : > { %271 = vst [vmem:[#allocation2 + $0x30] sm:$0xff] %v1305_v0 }
  0x7f   : > { %272 = vst [vmem:[#allocation2] sm:$0xff] %v1305_v0 }
  0x80   : > { %273 = vst [vmem:[#allocation2 + $0x58] sm:$0xff] %v1305_v0 }
  0x81   : > { %274 = vst [vmem:[#allocation2 + $0x18] sm:$0xff] %v1305_v0 }
  0x82   : > { %275 = vst [vmem:[#allocation2 + $0x50] sm:$0xff] %v1305_v0 }
  0x83   : > { %276 = vst [vmem:[#allocation2 + $0x68] sm:$0xff] %v1305_v0 }
  0x84   : > { %277 = vst [vmem:[#allocation2 + $0x8] sm:$0xff] %v1305_v0 }
  0x85   : > { %278 = vst [vmem:[#allocation2 + $0x48] sm:$0xff] %v1305_v0 }
  0x86   : > { %279 = vst [vmem:[#allocation2 + $0x40] sm:$0xff] %v1305_v0 }
  0x87   : > { %280 = vst [vmem:[#allocation2 + $0x20] sm:$0xff] %v1305_v0 }
  0x88   : > { %281 = vst [vmem:[#allocation2 + $0x10] sm:$0xff] %v1305_v0 }
  0x89   : > { %282 = vst [vmem:[#allocation2 + $0x38] sm:$0xff] %v1305_v0 }
  0x8a   : > { %283 = vst [vmem:[#allocation2 + $0x60] sm:$0xff] %v1305_v0 }
  0x8b   : > { %284 = vst [vmem:[#allocation2 + $0x70] sm:$0xff] %v1305_v0 }
  0x8c   : > { %285 = vst [vmem:[#allocation2 + $0x78] sm:$0xff] %v1305_v0 }
  0x8d   : > { %286 = vst [vmem:[#allocation2 + $0x28] sm:$0xff] %v1305_v0 }
  0x8e PF: > { %v318_v1 = vld [vmem:[%s1595_s24 + $0xf0] sm:$0xff]  ;;  %v415_v2 = vld [vmem:[%s1595_s24 + $0xf8] sm:$0xff]  ;;  %v317_v3 = vld [vmem:[%s1595_s24 + $0xe0] sm:$0xff]  ;;  %s863_s22 = sshll.u32 %s1286_s12, 1  ;;  %p864_p10 = scmp.ne.s32.totalorder %s1282_s11, 1 }
  0x8f   : > { %873 = vmatpush.xpose.msra.mxu2 %v318_v1  ;;  %889 = vmatpush.xpose.msra.mxu3 %v415_v2  ;;  %v414_v4 = vld [vmem:[%s1595_s24 + $0xe8] sm:$0xff]  ;;  %v316_v5 = vld [vmem:[%s1595_s24 + $0xd0] sm:$0xff]  ;;  %v413_v6 = vld [vmem:[%s1595_s24 + $0xd8] sm:$0xff]  ;;  %s594_s17 = sadd.s32 %s1282_s11, %s863_s22 }
  0x90   : > { %319 = vmatpush.xpose.msra.mxu0 %v318_v1  ;;  %416 = vmatpush.xpose.msra.mxu1 %v415_v2  ;;  %v315_v7 = vld [vmem:[%s1595_s24 + $0xc0] sm:$0xff]  ;;  %v412_v8 = vld [vmem:[%s1595_s24 + $0xc8] sm:$0xff]  ;;  %v314_v9 = vld [vmem:[%s1595_s24 + $0xb0] sm:$0xff]  ;;  %s595_s13 = sld [smem:[#allocation6 + %s594_s17]] }
  0x91   : > { %v411_v10 = vld [vmem:[%s1595_s24 + $0xb8] sm:$0xff]  ;;  %v313_v11 = vld [vmem:[%s1595_s24 + $0xa0] sm:$0xff]  ;;  %v410_v12 = vld [vmem:[%s1595_s24 + $0xa8] sm:$0xff] }
  0x92   : > { %v312_v13 = vld [vmem:[%s1595_s24 + $0x90] sm:$0xff]  ;;  %v409_v14 = vld [vmem:[%s1595_s24 + $0x98] sm:$0xff]  ;;  %v311_v15 = vld [vmem:[%s1595_s24 + $0x80] sm:$0xff] }
  0x93   : > { %874 = vmatpush.xpose.msra.mxu2 %v317_v3  ;;  %890 = vmatpush.xpose.msra.mxu3 %v414_v4  ;;  %v408_v16 = vld [vmem:[%s1595_s24 + $0x88] sm:$0xff]  ;;  %v310_v17 = vld [vmem:[%s1595_s24 + $0x70] sm:$0xff]  ;;  %v407_v18 = vld [vmem:[%s1595_s24 + $0x78] sm:$0xff] }
  0x94   : > { %320 = vmatpush.xpose.msra.mxu0 %v317_v3  ;;  %417 = vmatpush.xpose.msra.mxu1 %v414_v4  ;;  %v309_v19 = vld [vmem:[%s1595_s24 + $0x60] sm:$0xff]  ;;  %v406_v20 = vld [vmem:[%s1595_s24 + $0x68] sm:$0xff]  ;;  %v308_v21 = vld [vmem:[%s1595_s24 + $0x50] sm:$0xff] }
  0x95   : > { %v405_v22 = vld [vmem:[%s1595_s24 + $0x58] sm:$0xff]  ;;  %v307_v23 = vld [vmem:[%s1595_s24 + $0x40] sm:$0xff]  ;;  %v404_v24 = vld [vmem:[%s1595_s24 + $0x48] sm:$0xff] }
  0x96   : > { %v306_v25 = vld [vmem:[%s1595_s24 + $0x30] sm:$0xff]  ;;  %v403_v26 = vld [vmem:[%s1595_s24 + $0x38] sm:$0xff]  ;;  %v305_v27 = vld [vmem:[%s1595_s24 + $0x20] sm:$0xff]  ;;  %s596_s21 = scvt.s32.f32 %s595_s13 }
  0x97   : > { %875 = vmatpush.xpose.msra.mxu2 %v316_v5  ;;  %891 = vmatpush.xpose.msra.mxu3 %v413_v6  ;;  %v402_v28 = vld [vmem:[%s1595_s24 + $0x28] sm:$0xff]  ;;  %v304_v29 = vld [vmem:[%s1595_s24 + $0x10] sm:$0xff]  ;;  %v401_v30 = vld [vmem:[%s1595_s24 + $0x18] sm:$0xff] }
  0x98   : > { %321 = vmatpush.xpose.msra.mxu0 %v316_v5  ;;  %418 = vmatpush.xpose.msra.mxu1 %v413_v6  ;;  %v303_v31 = vld [vmem:[%s1595_s24] sm:$0xff]  ;;  %v400_v32 = vld [vmem:[%s1595_s24 + $0x8] sm:$0xff]  ;;  %v296_v37 = vld [vmem:[%s1588_s19 + $0x90] sm:$0xff] }
  0x99   : > { %v295_v33 = vld [vmem:[%s1588_s19 + $0x80] sm:$0xff]  ;;  %v392_v34 = vld [vmem:[%s1588_s19 + $0x88] sm:$0xff]  ;;  %v393_v38 = vld [vmem:[%s1588_s19 + $0x98] sm:$0xff] }
  0x9a   : > { %v287_v35 = vld [vmem:[%s1588_s19] sm:$0xff]  ;;  %v384_v36 = vld [vmem:[%s1588_s19 + $0x8] sm:$0xff]  ;;  %v288_v39 = vld [vmem:[%s1588_s19 + $0x10] sm:$0xff] }
  0x9b   : > { %876 = vmatpush.xpose.msra.mxu2 %v315_v7  ;;  %892 = vmatpush.xpose.msra.mxu3 %v412_v8  ;;  %v385_v40 = vld [vmem:[%s1588_s19 + $0x18] sm:$0xff]  ;;  %v297_v41 = vld [vmem:[%s1588_s19 + $0xa0] sm:$0xff]  ;;  %v394_v42 = vld [vmem:[%s1588_s19 + $0xa8] sm:$0xff] }
  0x9c   : > { %322 = vmatpush.xpose.msra.mxu0 %v315_v7  ;;  %419 = vmatpush.xpose.msra.mxu1 %v412_v8  ;;  %v289_v43 = vld [vmem:[%s1588_s19 + $0x20] sm:$0xff]  ;;  %v386_v44 = vld [vmem:[%s1588_s19 + $0x28] sm:$0xff]  ;;  %v298_v45 = vld [vmem:[%s1588_s19 + $0xb0] sm:$0xff]  ;;  %v1674_v8 = vstv %s596_s21 }
  0x9d   : > { %v395_v46 = vld [vmem:[%s1588_s19 + $0xb8] sm:$0xff]  ;;  %v290_v47 = vld [vmem:[%s1588_s19 + $0x30] sm:$0xff]  ;;  %v299_v49 = vld [vmem:[%s1588_s19 + $0xc0] sm:$0xff] }
  0x9e   : > { %v387_v48 = vld [vmem:[%s1588_s19 + $0x38] sm:$0xff]  ;;  %v396_v50 = vld [vmem:[%s1588_s19 + $0xc8] sm:$0xff]  ;;  %v291_v51 = vld [vmem:[%s1588_s19 + $0x40] sm:$0xff] }
  0x9f   : > { %877 = vmatpush.xpose.msra.mxu2 %v314_v9  ;;  %893 = vmatpush.xpose.msra.mxu3 %v411_v10  ;;  %v388_v52 = vld [vmem:[%s1588_s19 + $0x48] sm:$0xff]  ;;  %v300_v53 = vld [vmem:[%s1588_s19 + $0xd0] sm:$0xff]  ;;  %v397_v54 = vld [vmem:[%s1588_s19 + $0xd8] sm:$0xff] }
  0xa0   : > { %323 = vmatpush.xpose.msra.mxu0 %v314_v9  ;;  %420 = vmatpush.xpose.msra.mxu1 %v411_v10  ;;  %v292_v55 = vld [vmem:[%s1588_s19 + $0x50] sm:$0xff]  ;;  %v389_v56 = vld [vmem:[%s1588_s19 + $0x58] sm:$0xff]  ;;  %v301_v57 = vld [vmem:[%s1588_s19 + $0xe0] sm:$0xff] }
  0xa1   : > { %v398_v58 = vld [vmem:[%s1588_s19 + $0xe8] sm:$0xff]  ;;  %v293_v59 = vld [vmem:[%s1588_s19 + $0x60] sm:$0xff]  ;;  %v302_v61 = vld [vmem:[%s1588_s19 + $0xf0] sm:$0xff] }
  0xa2   : > { %v390_v60 = vld [vmem:[%s1588_s19 + $0x68] sm:$0xff]  ;;  %v399_v62 = vld [vmem:[%s1588_s19 + $0xf8] sm:$0xff]  ;;  %v294_v63 = vld [vmem:[%s1588_s19 + $0x70] sm:$0xff] }
  0xa3   : > { %878 = vmatpush.xpose.msra.mxu2 %v313_v11  ;;  %894 = vmatpush.xpose.msra.mxu3 %v410_v12  ;;  %v391_v0 = vld [vmem:[%s1588_s19 + $0x78] sm:$0xff] }
  0xa4   : > { %324 = vmatpush.xpose.msra.mxu0 %v313_v11  ;;  %421 = vmatpush.xpose.msra.mxu1 %v410_v12 }
  0xa7   : > { %879 = vmatpush.xpose.msra.mxu2 %v312_v13  ;;  %895 = vmatpush.xpose.msra.mxu3 %v409_v14 }
  0xa8   : > { %325 = vmatpush.xpose.msra.mxu0 %v312_v13  ;;  %422 = vmatpush.xpose.msra.mxu1 %v409_v14  ;;  %v597_v13 = vld [vmem:[#allocation2 + $0x30] sm:$0xff] }
  0xab   : > { %880 = vmatpush.xpose.msra.mxu2 %v311_v15  ;;  %896 = vmatpush.xpose.msra.mxu3 %v408_v16 }
  0xac   : > { %326 = vmatpush.xpose.msra.mxu0 %v311_v15  ;;  %423 = vmatpush.xpose.msra.mxu1 %v408_v16 }
  0xaf   : > { %881 = vmatpush.xpose.msra.mxu2 %v310_v17  ;;  %897 = vmatpush.xpose.msra.mxu3 %v407_v18 }
  0xb0   : > { %327 = vmatpush.xpose.msra.mxu0 %v310_v17  ;;  %424 = vmatpush.xpose.msra.mxu1 %v407_v18 }
  0xb3   : > { %882 = vmatpush.xpose.msra.mxu2 %v309_v19  ;;  %898 = vmatpush.xpose.msra.mxu3 %v406_v20 }
  0xb4   : > { %328 = vmatpush.xpose.msra.mxu0 %v309_v19  ;;  %425 = vmatpush.xpose.msra.mxu1 %v406_v20 }
  0xb7   : > { %883 = vmatpush.xpose.msra.mxu2 %v308_v21  ;;  %899 = vmatpush.xpose.msra.mxu3 %v405_v22 }
  0xb8   : > { %329 = vmatpush.xpose.msra.mxu0 %v308_v21  ;;  %426 = vmatpush.xpose.msra.mxu1 %v405_v22 }
  0xbb   : > { %884 = vmatpush.xpose.msra.mxu2 %v307_v23  ;;  %900 = vmatpush.xpose.msra.mxu3 %v404_v24 }
  0xbc   : > { %330 = vmatpush.xpose.msra.mxu0 %v307_v23  ;;  %427 = vmatpush.xpose.msra.mxu1 %v404_v24 }
  0xbf   : > { %885 = vmatpush.xpose.msra.mxu2 %v306_v25  ;;  %901 = vmatpush.xpose.msra.mxu3 %v403_v26 }
  0xc0   : > { %331 = vmatpush.xpose.msra.mxu0 %v306_v25  ;;  %428 = vmatpush.xpose.msra.mxu1 %v403_v26  ;;  %v605_v26 = vld [vmem:[#allocation2 + $0x40] sm:$0xff] }
  0xc3   : > { %886 = vmatpush.xpose.msra.mxu2 %v305_v27  ;;  %902 = vmatpush.xpose.msra.mxu3 %v402_v28 }
  0xc4   : > { %332 = vmatpush.xpose.msra.mxu0 %v305_v27  ;;  %429 = vmatpush.xpose.msra.mxu1 %v402_v28 }
  0xc7   : > { %887 = vmatpush.xpose.msra.mxu2 %v304_v29  ;;  %903 = vmatpush.xpose.msra.mxu3 %v401_v30 }
  0xc8   : > { %333 = vmatpush.xpose.msra.mxu0 %v304_v29  ;;  %430 = vmatpush.xpose.msra.mxu1 %v401_v30 }
  0xcb   : > { %888 = vmatpush.xpose.msra.mxu2 %v303_v31  ;;  %904 = vmatpush.xpose.msra.mxu3 %v400_v32 }
  0xcc   : > { %334 = vmatpush.xpose.msra.mxu0 %v303_v31  ;;  %431 = vmatpush.xpose.msra.mxu1 %v400_v32 }
  0xce   : > { %359 = vmatmul.f32.vlgmr.msra.gmra.mxu2 %v295_v33  ;;  %456 = vmatmul.f32.vlgmr.msra.gmra.mxu3 %v392_v34 }
  0xcf   : > { %335 = vmatmul.f32.vlgmr.msra.gmra.mxu0 %v287_v35  ;;  %432 = vmatmul.f32.vlgmr.msra.gmra.mxu1 %v384_v36  ;;  %v598_v35 = vld [vmem:[#allocation2] sm:$0xff] }
  0xd6   : > { %362 = vmatmul.f32.gmra.mxu2 %v296_v37  ;;  %459 = vmatmul.f32.gmra.mxu3 %v393_v38 }
  0xd7   : > { %338 = vmatmul.f32.gmra.mxu0 %v288_v39  ;;  %435 = vmatmul.f32.gmra.mxu1 %v385_v40 }
  0xde   : > { %365 = vmatmul.f32.gmra.mxu2 %v297_v41  ;;  %462 = vmatmul.f32.gmra.mxu3 %v394_v42 }
  0xdf   : > { %341 = vmatmul.f32.gmra.mxu0 %v289_v43  ;;  %438 = vmatmul.f32.gmra.mxu1 %v386_v44 }
  0xe6   : > { %368 = vmatmul.f32.gmra.mxu2 %v298_v45  ;;  %465 = vmatmul.f32.gmra.mxu3 %v395_v46 }
  0xe7   : > { %344 = vmatmul.f32.gmra.mxu0 %v290_v47  ;;  %441 = vmatmul.f32.gmra.mxu1 %v387_v48  ;;  %v606_v48 = vld [vmem:[#allocation2 + $0x20] sm:$0xff] }
  0xee   : > { %371 = vmatmul.f32.gmra.mxu2 %v299_v49  ;;  %468 = vmatmul.f32.gmra.mxu3 %v396_v50 }
  0xef   : > { %347 = vmatmul.f32.gmra.mxu0 %v291_v51  ;;  %444 = vmatmul.f32.gmra.mxu1 %v388_v52 }
  0xf6   : > { %374 = vmatmul.f32.gmra.mxu2 %v300_v53  ;;  %471 = vmatmul.f32.gmra.mxu3 %v397_v54 }
  0xf7   : > { %350 = vmatmul.f32.gmra.mxu0 %v292_v55  ;;  %447 = vmatmul.f32.gmra.mxu1 %v389_v56 }
  0xfe   : > { %377 = vmatmul.f32.gmra.mxu2 %v301_v57  ;;  %474 = vmatmul.f32.gmra.mxu3 %v398_v58  ;;  %v599_v57 = vld [vmem:[#allocation2 + $0x58] sm:$0xff] }
  0xff   : > { %353 = vmatmul.f32.gmra.mxu0 %v293_v59  ;;  %450 = vmatmul.f32.gmra.mxu1 %v390_v60 }
 0x106   : > { %380 = vmatmul.f32.gmra.mxu2 %v302_v61  ;;  %477 = vmatmul.f32.gmra.mxu3 %v399_v62 }
 0x107   : > { %356 = vmatmul.f32.gmra.mxu0 %v294_v63  ;;  %453 = vmatmul.f32.gmra.mxu1 %v391_v0 }
 0x14c   : > { %v336_v1 = vpop.f32.mrf.mxu0  ;;  %v433_v2 = vpop.f32.mrf.mxu1 }
 0x14d   : > { %v481_v3 = vsub.f32 %v336_v1, %v433_v2 }
 0x14f   : > { %v497_v4 = vand.u32 2147483647, %v481_v3  ;;  %v529_v5 = vmul.f32 0.5, %v481_v3 }
 0x151   : > { %vm513_vm0 = vcmp.lt.f32.partialorder %v497_v4, 1.0  ;;  %v545_v6 = vmul.f32 %v529_v5, %v481_v3  ;;  %v847_v7 = vadd.f32 -0.5, %v497_v4  ;;  %v360_v9 = vpop.f32.mrf.mxu2  ;;  %v457_v10 = vpop.f32.mrf.mxu3 }
 0x152   : > { %v489_v11 = vsub.f32 %v360_v9, %v457_v10 }
 0x153   : > { %v577_v12 = vsel %vm513_vm0, %v545_v6, %v847_v7  ;;  %v607_v6 = vld [vmem:[#allocation2 + $0x10] sm:$0xff] }
 0x154   : > { %v614_v14 = vmul.f32 %v1674_v8, %v577_v12  ;;  %v505_v15 = vand.u32 2147483647, %v489_v11  ;;  %v537_v16 = vmul.f32 0.5, %v489_v11  ;;  %v339_v17 = vpop.f32.mrf.mxu0  ;;  %v436_v18 = vpop.f32.mrf.mxu1 }
 0x155   : > { %v482_v19 = vsub.f32 %v339_v17, %v436_v18 }
 0x156   : > { %v630_v20 = vadd.f32 %v614_v14, %v597_v13  ;;  %vm521_vm1 = vcmp.lt.f32.partialorder %v505_v15, 1.0  ;;  %v553_v21 = vmul.f32 %v537_v16, %v489_v11  ;;  %v855_v22 = vadd.f32 -0.5, %v505_v15  ;;  %v600_v16 = vld [vmem:[#allocation2 + $0x18] sm:$0xff] }
 0x157   : > { %v498_v23 = vand.u32 2147483647, %v482_v19  ;;  %v530_v24 = vmul.f32 0.5, %v482_v19 }
 0x158   : > { %646 = vst [vmem:[#allocation2 + $0x30] sm:$0xff] %v630_v20  ;;  %v585_v25 = vsel %vm521_vm1, %v553_v21, %v855_v22 }
 0x159   : > { %v622_v27 = vmul.f32 %v1674_v8, %v585_v25  ;;  %vm514_vm2 = vcmp.lt.f32.partialorder %v498_v23, 1.0  ;;  %v546_v28 = vmul.f32 %v530_v24, %v482_v19  ;;  %v848_v29 = vadd.f32 -0.5, %v498_v23  ;;  %v363_v30 = vpop.f32.mrf.mxu2  ;;  %v460_v31 = vpop.f32.mrf.mxu3 }
 0x15a   : > { %v490_v32 = vsub.f32 %v363_v30, %v460_v31 }
 0x15b   : > { %v638_v33 = vadd.f32 %v622_v27, %v605_v26  ;;  %v578_v34 = vsel %vm514_vm2, %v546_v28, %v848_v29  ;;  %v608_v29 = vld [vmem:[#allocation2 + $0x38] sm:$0xff] }
 0x15c   : > { %v615_v36 = vmul.f32 %v1674_v8, %v578_v34  ;;  %v506_v37 = vand.u32 2147483647, %v490_v32  ;;  %v538_v38 = vmul.f32 0.5, %v490_v32  ;;  %v342_v39 = vpop.f32.mrf.mxu0  ;;  %v439_v40 = vpop.f32.mrf.mxu1 }
 0x15d   : > { %654 = vst [vmem:[#allocation2 + $0x40] sm:$0xff] %v638_v33  ;;  %v483_v41 = vsub.f32 %v342_v39, %v439_v40 }
 0x15e   : > { %v631_v42 = vadd.f32 %v615_v36, %v598_v35  ;;  %vm522_vm3 = vcmp.lt.f32.partialorder %v506_v37, 1.0  ;;  %v554_v43 = vmul.f32 %v538_v38, %v490_v32  ;;  %v856_v44 = vadd.f32 -0.5, %v506_v37  ;;  %v601_v38 = vld [vmem:[#allocation2 + $0x50] sm:$0xff] }
 0x15f   : > { %v499_v45 = vand.u32 2147483647, %v483_v41  ;;  %v531_v46 = vmul.f32 0.5, %v483_v41 }
 0x160   : > { %647 = vst [vmem:[#allocation2] sm:$0xff] %v631_v42  ;;  %v586_v47 = vsel %vm522_vm3, %v554_v43, %v856_v44 }
 0x161   : > { %v623_v49 = vmul.f32 %v1674_v8, %v586_v47  ;;  %vm515_vm4 = vcmp.lt.f32.partialorder %v499_v45, 1.0  ;;  %v547_v50 = vmul.f32 %v531_v46, %v483_v41  ;;  %v849_v51 = vadd.f32 -0.5, %v499_v45  ;;  %v366_v52 = vpop.f32.mrf.mxu2  ;;  %v463_v53 = vpop.f32.mrf.mxu3 }
 0x162   : > { %v491_v54 = vsub.f32 %v366_v52, %v463_v53 }
 0x163   : > { %v639_v55 = vadd.f32 %v623_v49, %v606_v48  ;;  %v579_v56 = vsel %vm515_vm4, %v547_v50, %v849_v51  ;;  %v609_v51 = vld [vmem:[#allocation2 + $0x60] sm:$0xff] }
 0x164   : > { %v616_v58 = vmul.f32 %v1674_v8, %v579_v56  ;;  %v507_v59 = vand.u32 2147483647, %v491_v54  ;;  %v539_v60 = vmul.f32 0.5, %v491_v54  ;;  %v345_v61 = vpop.f32.mrf.mxu0  ;;  %v442_v62 = vpop.f32.mrf.mxu1 }
 0x165   : > { %655 = vst [vmem:[#allocation2 + $0x20] sm:$0xff] %v639_v55  ;;  %v484_v63 = vsub.f32 %v345_v61, %v442_v62 }
 0x166   : > { %v632_v0 = vadd.f32 %v616_v58, %v599_v57  ;;  %vm523_vm5 = vcmp.lt.f32.partialorder %v507_v59, 1.0  ;;  %v555_v1 = vmul.f32 %v539_v60, %v491_v54  ;;  %v857_v2 = vadd.f32 -0.5, %v507_v59  ;;  %v602_v60 = vld [vmem:[#allocation2 + $0x68] sm:$0xff] }
 0x167   : > { %v500_v3 = vand.u32 2147483647, %v484_v63  ;;  %v532_v4 = vmul.f32 0.5, %v484_v63 }
 0x168   : > { %648 = vst [vmem:[#allocation2 + $0x58] sm:$0xff] %v632_v0  ;;  %v587_v5 = vsel %vm523_vm5, %v555_v1, %v857_v2 }
 0x169   : > { %v624_v7 = vmul.f32 %v1674_v8, %v587_v5  ;;  %vm516_vm6 = vcmp.lt.f32.partialorder %v500_v3, 1.0  ;;  %v548_v9 = vmul.f32 %v532_v4, %v484_v63  ;;  %v850_v10 = vadd.f32 -0.5, %v500_v3  ;;  %v369_v11 = vpop.f32.mrf.mxu2  ;;  %v466_v12 = vpop.f32.mrf.mxu3 }
 0x16a   : > { %v492_v13 = vsub.f32 %v369_v11, %v466_v12 }
 0x16b   : > { %v640_v14 = vadd.f32 %v624_v7, %v607_v6  ;;  %v580_v15 = vsel %vm516_vm6, %v548_v9, %v850_v10  ;;  %v610_v10 = vld [vmem:[#allocation2 + $0x70] sm:$0xff] }
 0x16c   : > { %v617_v17 = vmul.f32 %v1674_v8, %v580_v15  ;;  %v508_v18 = vand.u32 2147483647, %v492_v13  ;;  %v540_v19 = vmul.f32 0.5, %v492_v13  ;;  %v348_v20 = vpop.f32.mrf.mxu0  ;;  %v445_v21 = vpop.f32.mrf.mxu1 }
 0x16d   : > { %656 = vst [vmem:[#allocation2 + $0x10] sm:$0xff] %v640_v14  ;;  %v485_v22 = vsub.f32 %v348_v20, %v445_v21 }
 0x16e   : > { %v633_v23 = vadd.f32 %v617_v17, %v600_v16  ;;  %vm524_vm7 = vcmp.lt.f32.partialorder %v508_v18, 1.0  ;;  %v556_v24 = vmul.f32 %v540_v19, %v492_v13  ;;  %v858_v25 = vadd.f32 -0.5, %v508_v18  ;;  %v603_v19 = vld [vmem:[#allocation2 + $0x8] sm:$0xff] }
 0x16f   : > { %v501_v26 = vand.u32 2147483647, %v485_v22  ;;  %v533_v27 = vmul.f32 0.5, %v485_v22 }
 0x170   : > { %649 = vst [vmem:[#allocation2 + $0x18] sm:$0xff] %v633_v23  ;;  %v588_v28 = vsel %vm524_vm7, %v556_v24, %v858_v25 }
 0x171   : > { %v625_v30 = vmul.f32 %v1674_v8, %v588_v28  ;;  %vm517_vm8 = vcmp.lt.f32.partialorder %v501_v26, 1.0  ;;  %v549_v31 = vmul.f32 %v533_v27, %v485_v22  ;;  %v851_v32 = vadd.f32 -0.5, %v501_v26  ;;  %v372_v33 = vpop.f32.mrf.mxu2  ;;  %v469_v34 = vpop.f32.mrf.mxu3 }
 0x172   : > { %v493_v35 = vsub.f32 %v372_v33, %v469_v34 }
 0x173   : > { %v641_v36 = vadd.f32 %v625_v30, %v608_v29  ;;  %v581_v37 = vsel %vm517_vm8, %v549_v31, %v851_v32  ;;  %v611_v32 = vld [vmem:[#allocation2 + $0x78] sm:$0xff] }
 0x174   : > { %v618_v39 = vmul.f32 %v1674_v8, %v581_v37  ;;  %v509_v40 = vand.u32 2147483647, %v493_v35  ;;  %v541_v41 = vmul.f32 0.5, %v493_v35  ;;  %v351_v42 = vpop.f32.mrf.mxu0  ;;  %v448_v43 = vpop.f32.mrf.mxu1 }
 0x175   : > { %657 = vst [vmem:[#allocation2 + $0x38] sm:$0xff] %v641_v36  ;;  %v486_v44 = vsub.f32 %v351_v42, %v448_v43 }
 0x176   : > { %v634_v45 = vadd.f32 %v618_v39, %v601_v38  ;;  %vm525_vm9 = vcmp.lt.f32.partialorder %v509_v40, 1.0  ;;  %v557_v46 = vmul.f32 %v541_v41, %v493_v35  ;;  %v859_v47 = vadd.f32 -0.5, %v509_v40  ;;  %v604_v41 = vld [vmem:[#allocation2 + $0x48] sm:$0xff] }
 0x177   : > { %v502_v48 = vand.u32 2147483647, %v486_v44  ;;  %v534_v49 = vmul.f32 0.5, %v486_v44 }
 0x178   : > { %650 = vst [vmem:[#allocation2 + $0x50] sm:$0xff] %v634_v45  ;;  %v589_v50 = vsel %vm525_vm9, %v557_v46, %v859_v47 }
 0x179   : > { %v626_v52 = vmul.f32 %v1674_v8, %v589_v50  ;;  %vm518_vm10 = vcmp.lt.f32.partialorder %v502_v48, 1.0  ;;  %v550_v53 = vmul.f32 %v534_v49, %v486_v44  ;;  %v852_v54 = vadd.f32 -0.5, %v502_v48  ;;  %v375_v55 = vpop.f32.mrf.mxu2  ;;  %v472_v56 = vpop.f32.mrf.mxu3  ;;  %v612_v49 = vld [vmem:[#allocation2 + $0x28] sm:$0xff] }
 0x17a   : > { %v494_v57 = vsub.f32 %v375_v55, %v472_v56 }
 0x17b   : > { %v642_v58 = vadd.f32 %v626_v52, %v609_v51  ;;  %v582_v59 = vsel %vm518_vm10, %v550_v53, %v852_v54 }
 0x17c   : > { %v619_v61 = vmul.f32 %v1674_v8, %v582_v59  ;;  %v510_v62 = vand.u32 2147483647, %v494_v57  ;;  %v542_v63 = vmul.f32 0.5, %v494_v57  ;;  %v354_v0 = vpop.f32.mrf.mxu0  ;;  %v451_v1 = vpop.f32.mrf.mxu1 }
 0x17d   : > { %658 = vst [vmem:[#allocation2 + $0x60] sm:$0xff] %v642_v58  ;;  %v487_v2 = vsub.f32 %v354_v0, %v451_v1 }
 0x17e   : > { %v635_v3 = vadd.f32 %v619_v61, %v602_v60  ;;  %vm526_vm11 = vcmp.lt.f32.partialorder %v510_v62, 1.0  ;;  %v558_v4 = vmul.f32 %v542_v63, %v494_v57  ;;  %v860_v5 = vadd.f32 -0.5, %v510_v62 }
 0x17f   : > { %v503_v6 = vand.u32 2147483647, %v487_v2  ;;  %v535_v7 = vmul.f32 0.5, %v487_v2 }
 0x180   : > { %651 = vst [vmem:[#allocation2 + $0x68] sm:$0xff] %v635_v3  ;;  %v590_v9 = vsel %vm526_vm11, %v558_v4, %v860_v5 }
 0x181   : > { %v627_v11 = vmul.f32 %v1674_v8, %v590_v9  ;;  %vm519_vm12 = vcmp.lt.f32.partialorder %v503_v6, 1.0  ;;  %v551_v12 = vmul.f32 %v535_v7, %v487_v2  ;;  %v853_v13 = vadd.f32 -0.5, %v503_v6  ;;  %v378_v14 = vpop.f32.mrf.mxu2  ;;  %v475_v15 = vpop.f32.mrf.mxu3 }
 0x182   : > { %v495_v16 = vsub.f32 %v378_v14, %v475_v15 }
 0x183   : > { %v643_v17 = vadd.f32 %v627_v11, %v610_v10  ;;  %v583_v18 = vsel %vm519_vm12, %v551_v12, %v853_v13 }
 0x184   : > { %v620_v20 = vmul.f32 %v1674_v8, %v583_v18  ;;  %v511_v21 = vand.u32 2147483647, %v495_v16  ;;  %v543_v22 = vmul.f32 0.5, %v495_v16  ;;  %v357_v23 = vpop.f32.mrf.mxu0  ;;  %v454_v24 = vpop.f32.mrf.mxu1 }
 0x185   : > { %659 = vst [vmem:[#allocation2 + $0x70] sm:$0xff] %v643_v17  ;;  %v488_v25 = vsub.f32 %v357_v23, %v454_v24 }
 0x186   : > { %v636_v26 = vadd.f32 %v620_v20, %v603_v19  ;;  %vm527_vm13 = vcmp.lt.f32.partialorder %v511_v21, 1.0  ;;  %v559_v27 = vmul.f32 %v543_v22, %v495_v16  ;;  %v861_v28 = vadd.f32 -0.5, %v511_v21 }
 0x187   : > { %v504_v29 = vand.u32 2147483647, %v488_v25  ;;  %v536_v30 = vmul.f32 0.5, %v488_v25 }
 0x188   : > { %652 = vst [vmem:[#allocation2 + $0x8] sm:$0xff] %v636_v26  ;;  %v591_v31 = vsel %vm527_vm13, %v559_v27, %v861_v28 }
 0x189   : > { %v628_v33 = vmul.f32 %v1674_v8, %v591_v31  ;;  %vm520_vm14 = vcmp.lt.f32.partialorder %v504_v29, 1.0  ;;  %v552_v34 = vmul.f32 %v536_v30, %v488_v25  ;;  %v854_v35 = vadd.f32 -0.5, %v504_v29  ;;  %v381_v36 = vpop.f32.mrf.mxu2  ;;  %v478_v37 = vpop.f32.mrf.mxu3 }
 0x18a   : > { %v496_v38 = vsub.f32 %v381_v36, %v478_v37 }
 0x18b   : > { %v644_v39 = vadd.f32 %v628_v33, %v611_v32  ;;  %v584_v40 = vsel %vm520_vm14, %v552_v34, %v854_v35 }
 0x18c   : > { %v621_v42 = vmul.f32 %v1674_v8, %v584_v40  ;;  %v512_v43 = vand.u32 2147483647, %v496_v38  ;;  %v544_v44 = vmul.f32 0.5, %v496_v38 }
 0x18d   : > { %660 = vst [vmem:[#allocation2 + $0x78] sm:$0xff] %v644_v39 }
 0x18e   : > { %v637_v45 = vadd.f32 %v621_v42, %v604_v41  ;;  %vm528_vm15 = vcmp.lt.f32.partialorder %v512_v43, 1.0  ;;  %v560_v46 = vmul.f32 %v544_v44, %v496_v38  ;;  %v862_v47 = vadd.f32 -0.5, %v512_v43 }
 0x190   : > { %653 = vst [vmem:[#allocation2 + $0x48] sm:$0xff] %v637_v45  ;;  %v592_v48 = vsel %vm528_vm15, %v560_v46, %v862_v47 }
 0x191   : > { %v629_v50 = vmul.f32 %v1674_v8, %v592_v48  ;;  %665 = sbr.rel (%p864_p10) target bundleno = 450 (0x1c2), region = 44 }
 0x193   : > { %v645_v51 = vadd.f32 %v629_v50, %v612_v49 }
 0x195   : > { %661 = vst [vmem:[#allocation2 + $0x28] sm:$0xff] %v645_v51 }
 0x196   : > { %v666_v52 = vld [vmem:[#allocation2 + $0x30] sm:$0xff]  ;;  %v667_v53 = vld [vmem:[#allocation2] sm:$0xff]  ;;  %v668_v54 = vld [vmem:[#allocation2 + $0x58] sm:$0xff] }
 0x197   : > { %v682_v55 = vadd.f32 %v667_v53, %v666_v52  ;;  %v669_v56 = vld [vmem:[#allocation2 + $0x18] sm:$0xff]  ;;  %v670_v58 = vld [vmem:[#allocation2 + $0x50] sm:$0xff]  ;;  %v671_v60 = vld [vmem:[#allocation2 + $0x68] sm:$0xff] }
 0x198   : > { %v672_v62 = vld [vmem:[#allocation2 + $0x8] sm:$0xff]  ;;  %v674_v8 = vld [vmem:[#allocation2 + $0x40] sm:$0xff]  ;;  %v676_v5 = vld [vmem:[#allocation2 + $0x10] sm:$0xff] }
 0x199   : > { %v683_v57 = vadd.f32 %v682_v55, %v668_v54  ;;  %v673_v0 = vld [vmem:[#allocation2 + $0x48] sm:$0xff]  ;;  %v675_v3 = vld [vmem:[#allocation2 + $0x20] sm:$0xff]  ;;  %v677_v7 = vld [vmem:[#allocation2 + $0x38] sm:$0xff] }
 0x19a   : > { %v678_v10 = vld [vmem:[#allocation2 + $0x60] sm:$0xff]  ;;  %v679_v12 = vld [vmem:[#allocation2 + $0x70] sm:$0xff]  ;;  %v680_v14 = vld [vmem:[#allocation2 + $0x78] sm:$0xff] }
 0x19b   : > { %v684_v59 = vadd.f32 %v683_v57, %v669_v56 }
 0x19c   : > { %v681_v16 = vld [vmem:[#allocation2 + $0x28] sm:$0xff] }
 0x19d   : > { %v685_v61 = vadd.f32 %v684_v59, %v670_v58 }
 0x19f   : > { %v686_v63 = vadd.f32 %v685_v61, %v671_v60 }
 0x1a1   : > { %v687_v1 = vadd.f32 %v686_v63, %v672_v62 }
 0x1a3   : > { %v688_v2 = vadd.f32 %v687_v1, %v673_v0 }
 0x1a5   : > { %v689_v4 = vadd.f32 %v688_v2, %v674_v8 }
 0x1a7   : > { %v690_v6 = vadd.f32 %v689_v4, %v675_v3 }
 0x1a9   : > { %v691_v9 = vadd.f32 %v690_v6, %v676_v5 }
 0x1ab   : > { %v692_v11 = vadd.f32 %v691_v9, %v677_v7 }
 0x1ad   : > { %v693_v13 = vadd.f32 %v692_v11, %v678_v10 }
 0x1af   : > { %v694_v15 = vadd.f32 %v693_v13, %v679_v12 }
 0x1b1   : > { %v695_v17 = vadd.f32 %v694_v15, %v680_v14 }
 0x1b3   : > { %v696_v18 = vadd.f32 %v695_v17, %v681_v16 }
 0x1b5   : > { %v697_v19 = vrot.slane %v696_v18, 4 }
 0x1b7   : > { %v698_v20 = vadd.f32 %v697_v19, %v696_v18 }
 0x1b9   : > { %v699_v21 = vrot.slane %v698_v20, 2 }
 0x1bb   : > { %v700_v22 = vadd.f32 %v699_v21, %v698_v20 }
 0x1bd   : > { %v701_v23 = vrot.slane %v700_v22, 1 }
 0x1bf   : > { %v702_v24 = vadd.f32 %v701_v23, %v700_v22 }
 0x1c1   : > { %703 = vst [vmem:[%s258_s26] sm:$0xff] %v702_v24 }
 0x1c2 PF: > { %s866_s11 = sshll.u32 %s1286_s12, 3  ;;  %s1818_s6 = sld [smem:[#allocation32_spill]] }
 0x1c3   : > { %s717_s23 = sshll.u32 %s258_s26, 4  ;;  %s705_s16 = scalar_lea.sflag [#allocation9], %s256_s10  ;;  %s718_s23 = int_to_ptr.vmem [resolvable:$true] %s717_s23 }
 0x1c8   : > { %s1819_s27 = smov %s1818_s6  ;;  %s715_s25 = scalar_lea.hbm %s1818_s6, %s866_s11 }
 0x1c9   : > { %s719_s20 = sshll.u32 %s715_s25, 4  ;;  %s1166_s5 = scalar_lea.hbm %s1819_s27, 16  ;;  %s720_s20 = int_to_ptr.hbm [resolvable:$true] %s719_s20 }
 0x1ca   : > { %s1160_s19 = sshra.s32 %s720_s20, 4  ;;  %s1161_s19 = int_to_ptr.hbm [resolvable:$true] %s1160_s19 }
 0x1cb   : > { %s1162_s0 = scalar_lea.hbm %s1161_s19, 8  ;;  %p1167_p5 = scmp.lt.s32.totalorder %s1161_s19, %s1819_s27 }
 0x1cc   : > { %p1163_p12 = scmp.ne.s32.totalorder %s1161_s19, %s1162_s0  ;;  %p1168_p9 = scmp.lt.s32.totalorder %s1166_s5, %s1162_s0 }
 0x1ce   : > { %p1164_p8 = pnand %p1163_p12, %p1471_p13  ;;  %p1169_p3 = por %p1168_p9, %p1167_p5 }
 0x1d0   : > { %p1165_p6 = pneg %p1164_p8 }
 0x1d2   : > { %p1170_p0 = pnand %p1169_p3, %p1165_p6 }
 0x1d4   : > { %1173 = shalt.err (!%p1170_p0)
}
 0x1d5   : > { %913 = dma.vmem_to_hbm [thread:$0]  (%p1471_p13), %s718_s23, 128, %s720_s20, %s705_s16  }
 0x1d6 PF: > { %s1820_s10 = sld [smem:[#allocation21_spill]]  ;;  %p931_p2 = scmp.ge.s32.totalorder %s1298_s15, 2 }
 0x1d7   : > { %s1821_s28 = sld [smem:[#allocation29_spill]] }
 0x1dc   : > { %s731_s26 = sand.u32 1, %s1820_s10  }
 0x1dd   : > { %p1822_p11 = scmp.ne.s32.totalorder %s1821_s28, 0  ;;  %s732_s17 = scalar_lea.sflag [#allocation9], %s731_s26 }
 0x1df   : > { %p927_p1 = pnand %p931_p2, %p1822_p11 }
 0x1e1   : > { %p928_p4 = pneg %p927_p1 }
 0x1e3   : > { %1241 = dma.done.wait (%p928_p4), %s732_s17, 128  }
 0x1e4   : > { %1243 = vsyncadd (%p928_p4), %s732_s17, 4294967168  ;;  %s42_s15 = sadd.s32 1, %s1298_s15   ;;  %s1824_s8 = sld [smem:[#allocation22_spill]] }
 0x1e5   : > { %p1718_p7 = scmp.ge.s32.totalorder %s42_s15, 6   ;;  %s1825_s30 = sld [smem:[#allocation28_spill]] }
 0x1e6   : > { %s1826_s21 = sld [smem:[#allocation23_spill]]  ;;  %s1833_s0 = smov %s1250_s1 }
 0x1e7   : > { %s1827_s10 = sld [smem:[#allocation30_spill]]  ;;  %s1835_s6 = smov %s1262_s2 }
 0x1e8   : > { %s1828_s11 = sld [smem:[#allocation24_spill]]  ;;  %s1836_s2 = smov %s1266_s7 }
 0x1e9   : > { %s1829_s12 = sld [smem:[#allocation25_spill]]  ;;  %s1837_s7 = smov %s1542_s29 }
 0x1ea   : > { %s1830_s18 = sld [smem:[#allocation26_spill]]  ;;  %s1834_s1 = smov %s1824_s8 }
 0x1eb   : > { %s1831_s14 = sld [smem:[#allocation27_spill]]  ;;  %s1838_s8 = smov %s1274_s9 }
 0x1ec   : > { %s1839_s9 = smov %s1826_s21  ;;  %41 = sbr.rel (!%p1718_p7) target bundleno = 22 (0x16), region = 94 }
 0x1f0   : > { %s1840_s13 = smov %s1830_s18 }
 0x1f1   :  { %738 = vsyncpa [#allocation8], 1 }
 0x1f2   :  { %740 = vsyncpa [#allocation8 + $0x1], 1 }
 0x1f3   :  { %741 = vsyncpa [#allocation11], 1 }
 0x1f4   :  { %743 = vsyncpa [#allocation11 + $0x1], 1 }
 0x1f5   :  { %744 = vsyncpa [#allocation9], 1 }
 0x1f6   :  { %746 = vsyncpa [#allocation9 + $0x1], 1 }

</bundles_post_ra>
